<compile_context>
chip_gen: v7x
topology: tpu7x:2x2x1
jax: 0.10.0
libtpu: 0.0.40
codegen_flags: <defaults>
</compile_context>

<pallas_src>
import jax
import jax.numpy as jnp
from jax.experimental import pallas as pl
from jax.experimental.pallas import tpu as pltpu


def _round_up(n, m):
    return ((n + m - 1) // m) * m


def _pick_tile_b(B, *, max_tile=4096, lane=128):
    """Pick (tile_b, padded_batch).  tile_b is a multiple of 128, capped at max_tile.
    Once the batch spans >1 lane tile we force >=2 grid steps (megacore on v7x) and
    size the tile to minimize padding instead of always padding up to max_tile."""
    Bg = _round_up(max(B, 1), lane)
    if Bg <= lane:
        return lane, lane
    num_steps = max(2, pl.cdiv(Bg, max_tile))
    tile = min(_round_up(pl.cdiv(Bg, num_steps), lane), max_tile)
    return tile, _round_up(Bg, tile)


def mlp_kernel(x_ref, w1_ref, b1_ref, w2_ref, b2_ref, w3_ref, b3_ref,
               w4_ref, b4_ref, o_ref):
    # Activations live in [hidden, batch] layout: batch on the lane axis throughout.
    h = jnp.dot(w1_ref[...], x_ref[...], preferred_element_type=jnp.float32)       # (128, tb)
    h = jnp.maximum(h + b1_ref[...], 0.0)
    h = jnp.dot(w2_ref[...], h.astype(jnp.bfloat16),
                preferred_element_type=jnp.float32)                                 # (128, tb)
    h = jnp.maximum(h + b2_ref[...], 0.0)
    h = jnp.dot(w3_ref[...], h.astype(jnp.bfloat16),
                preferred_element_type=jnp.float32)                                 # (32, tb)
    h = jnp.maximum(h + b3_ref[...], 0.0)
    o = jnp.dot(w4_ref[...], h.astype(jnp.bfloat16),
                preferred_element_type=jnp.float32)                                 # (1, tb)
    o_ref[...] = (o + b4_ref[...]).astype(o_ref.dtype)


def mlp_forward(x, params, *, max_tile_b=4096):
    """x: [B, F] float.  params: PyTorch-layout weights w1..w4 as [out, in], biases b1..b4
    as [out, 1] (f32).  Returns [B, 1] f32."""
    B, F = x.shape
    tile_b, Bp = _pick_tile_b(B, max_tile=max_tile_b)
    num_tiles = Bp // tile_b

    xp = x if Bp == B else jnp.pad(x, ((0, Bp - B), (0, 0)))
    xp = xp.astype(jnp.bfloat16).T                                   # (F, Bp), batch on lanes

    as_bf16 = lambda a: a.astype(jnp.bfloat16)
    as_f32 = lambda a: a.astype(jnp.float32)
    w1, w2, w3, w4 = (as_bf16(params[k]) for k in ("w1", "w2", "w3", "w4"))
    b1, b2, b3, b4 = (as_f32(params[k]) for k in ("b1", "b2", "b3", "b4"))

    # Whole-array blocks with constant index maps -> VMEM-resident across grid steps.
    full = lambda a: pl.BlockSpec(a.shape, lambda i: (0,) * a.ndim)

    flops = 2 * Bp * (F * 128 + 128 * 128 + 128 * 32 + 32)
    bytes_accessed = (xp.size * 2
                      + sum(int(w.size) * 2 for w in (w1, w2, w3, w4))
                      + sum(int(b.size) * 4 for b in (b1, b2, b3, b4))
                      + Bp * 4)

    out = pl.pallas_call(
        mlp_kernel,
        out_shape=jax.ShapeDtypeStruct((1, Bp), jnp.float32),
        grid_spec=pltpu.PrefetchScalarGridSpec(
            num_scalar_prefetch=0,
            grid=(num_tiles,),
            in_specs=[
                pl.BlockSpec((F, tile_b), lambda i: (0, i)),          # x^T batch tile
                full(w1), full(b1),
                full(w2), full(b2),
                full(w3), full(b3),
                full(w4), full(b4),
            ],
            out_specs=pl.BlockSpec((1, tile_b), lambda i: (0, i)),    # lane-dense output row
        ),
        compiler_params=pltpu.CompilerParams(
            dimension_semantics=("parallel",),
            vmem_limit_bytes=32 * 1024 * 1024),
        cost_estimate=pl.CostEstimate(
            flops=int(flops), transcendentals=0,
            bytes_accessed=int(bytes_accessed)),
    )(xp, w1, b1, w2, b2, w3, b3, w4, b4)

    # (1, Bp) -> (Bp, 1) -> drop padded rows.
    return out.reshape(Bp, 1)[:B]


def init_params(key, in_features):
    """PyTorch nn.Linear default init: U(-1/sqrt(fan_in), 1/sqrt(fan_in)).
    Weights kept in native PyTorch [out, in] layout; biases as [out, 1]."""
    layer_dims = [("w1", "b1", in_features, 128),
                  ("w2", "b2", 128, 128),
                  ("w3", "b3", 128, 32),
                  ("w4", "b4", 32, 1)]
    params = {}
    for wname, bname, fan_in, fan_out in layer_dims:
        key, kw, kb = jax.random.split(key, 3)
        bound = 1.0 / float(fan_in) ** 0.5
        params[wname] = jax.random.uniform(kw, (fan_out, fan_in), jnp.float32, -bound, bound)
        params[bname] = jax.random.uniform(kb, (fan_out, 1), jnp.float32, -bound, bound)
    return params


def mlp_reference(x, params):
    """Pure-JAX reference matching the kernel numerics (bf16 operands, f32 accumulation)."""
    bf16 = jnp.bfloat16
    h = x.astype(bf16)
    for idx in (1, 2, 3):
        h = jnp.dot(h, params[f"w{idx}"].astype(bf16).T,
                    preferred_element_type=jnp.float32) + params[f"b{idx}"].T
        h = jnp.maximum(h, 0.0).astype(bf16)
    return jnp.dot(h, params["w4"].astype(bf16).T,
                   preferred_element_type=jnp.float32) + params["b4"].T


if __name__ == "__main__":
    key = jax.random.PRNGKey(0)
    k_x, k_x2, k_p = jax.random.split(key, 3)

    batch, features = 16, 14  # Tabular Playground Jan 2021 has 14 continuous features
    params = init_params(k_p, features)

    # Small demo batch (single grid step).
    x = jax.random.normal(k_x, (batch, features), dtype=jnp.float32)
    out = jax.block_until_ready(mlp_forward(x, params))
    ref = mlp_reference(x, params)
    assert out.shape == (batch, 1)
    assert jnp.allclose(out, ref, atol=2e-3, rtol=2e-3), "mismatch vs JAX reference (small)"

    # Non-multiple batch exercising the multi-step (>=2 grid steps) + padding path.
    x2 = jax.random.normal(k_x2, (300, features), dtype=jnp.float32)
    out2 = jax.block_until_ready(mlp_forward(x2, params))
    ref2 = mlp_reference(x2, params)
    assert out2.shape == (300, 1)
    assert jnp.allclose(out2, ref2, atol=2e-3, rtol=2e-3), "mismatch vs JAX reference (multi-tile)"

    print("KERNEL_OK")
</pallas_src>

<mosaic_0001>
module attributes {stable_mosaic.version = 11 : i64} {
  func.func @mlp_kernel(%arg0: i32, %arg1: memref<14x128xbf16, #tpu.memory_space<vmem>>, %arg2: memref<128x14xbf16, #tpu.memory_space<vmem>>, %arg3: memref<128x1xf32, #tpu.memory_space<vmem>>, %arg4: memref<128x128xbf16, #tpu.memory_space<vmem>>, %arg5: memref<128x1xf32, #tpu.memory_space<vmem>>, %arg6: memref<32x128xbf16, #tpu.memory_space<vmem>>, %arg7: memref<32x1xf32, #tpu.memory_space<vmem>>, %arg8: memref<1x32xbf16, #tpu.memory_space<vmem>>, %arg9: memref<1x1xf32, #tpu.memory_space<vmem>>, %arg10: memref<1x128xf32, #tpu.memory_space<vmem>>) attributes {dimension_semantics = [#tpu.dimension_semantics<parallel>], iteration_bounds = array<i64: 1>, scalar_prefetch = 0 : i64, scratch_operands = 0 : i64, tpu.core_type = #tpu.core_type<tc>, window_params = [{transform_indices = @transform_0, window_bounds = array<i64: 14, 128>}, {pipeline_mode = #tpu.pipeline_mode<synchronous>, transform_indices = @transform_1, window_bounds = array<i64: 128, 14>}, {pipeline_mode = #tpu.pipeline_mode<synchronous>, transform_indices = @transform_2, window_bounds = array<i64: 128, 1>}, {pipeline_mode = #tpu.pipeline_mode<synchronous>, transform_indices = @transform_3, window_bounds = array<i64: 128, 128>}, {pipeline_mode = #tpu.pipeline_mode<synchronous>, transform_indices = @transform_4, window_bounds = array<i64: 128, 1>}, {pipeline_mode = #tpu.pipeline_mode<synchronous>, transform_indices = @transform_5, window_bounds = array<i64: 32, 128>}, {pipeline_mode = #tpu.pipeline_mode<synchronous>, transform_indices = @transform_6, window_bounds = array<i64: 32, 1>}, {pipeline_mode = #tpu.pipeline_mode<synchronous>, transform_indices = @transform_7, window_bounds = array<i64: 1, 32>}, {pipeline_mode = #tpu.pipeline_mode<synchronous>, transform_indices = @transform_8, window_bounds = array<i64: 1, 1>}, {transform_indices = @transform_9, window_bounds = array<i64: 1, 128>}]} {
    %c0 = arith.constant 0 : index
    %c0_0 = arith.constant 0 : index
    %0 = vector.load %arg2[%c0, %c0_0] : memref<128x14xbf16, #tpu.memory_space<vmem>>, vector<128x14xbf16>
    %c0_1 = arith.constant 0 : index
    %c0_2 = arith.constant 0 : index
    %1 = vector.load %arg1[%c0_1, %c0_2] : memref<14x128xbf16, #tpu.memory_space<vmem>>, vector<14x128xbf16>
    %cst = arith.constant dense<0.000000e+00> : vector<128x128xf32>
    %2 = tpu.matmul %0, %1, %cst {dimension_numbers = #tpu.dot_dimension_numbers<[1], [0], [0], [1], [0, 0, 1, 1], [], []>} : vector<128x14xbf16>, vector<14x128xbf16>, vector<128x128xf32> -> vector<128x128xf32>
    %c0_3 = arith.constant 0 : index
    %c0_4 = arith.constant 0 : index
    %3 = vector.load %arg3[%c0_3, %c0_4] : memref<128x1xf32, #tpu.memory_space<vmem>>, vector<128x1xf32>
    %4 = vector.broadcast %3 : vector<128x1xf32> to vector<128x128xf32>
    %5 = arith.addf %2, %4 : vector<128x128xf32>
    %cst_5 = arith.constant 0.000000e+00 : f32
    %6 = vector.broadcast %cst_5 : f32 to vector<128x128xf32>
    %7 = arith.maximumf %5, %6 : vector<128x128xf32>
    %c0_6 = arith.constant 0 : index
    %c0_7 = arith.constant 0 : index
    %8 = vector.load %arg4[%c0_6, %c0_7] : memref<128x128xbf16, #tpu.memory_space<vmem>>, vector<128x128xbf16>
    %9 = arith.truncf %7 : vector<128x128xf32> to vector<128x128xbf16>
    %cst_8 = arith.constant dense<0.000000e+00> : vector<128x128xf32>
    %10 = tpu.matmul %8, %9, %cst_8 {dimension_numbers = #tpu.dot_dimension_numbers<[1], [0], [0], [1], [0, 0, 1, 1], [], []>} : vector<128x128xbf16>, vector<128x128xbf16>, vector<128x128xf32> -> vector<128x128xf32>
    %c0_9 = arith.constant 0 : index
    %c0_10 = arith.constant 0 : index
    %11 = vector.load %arg5[%c0_9, %c0_10] : memref<128x1xf32, #tpu.memory_space<vmem>>, vector<128x1xf32>
    %12 = vector.broadcast %11 : vector<128x1xf32> to vector<128x128xf32>
    %13 = arith.addf %10, %12 : vector<128x128xf32>
    %cst_11 = arith.constant 0.000000e+00 : f32
    %14 = vector.broadcast %cst_11 : f32 to vector<128x128xf32>
    %15 = arith.maximumf %13, %14 : vector<128x128xf32>
    %c0_12 = arith.constant 0 : index
    %c0_13 = arith.constant 0 : index
    %16 = vector.load %arg6[%c0_12, %c0_13] : memref<32x128xbf16, #tpu.memory_space<vmem>>, vector<32x128xbf16>
    %17 = arith.truncf %15 : vector<128x128xf32> to vector<128x128xbf16>
    %cst_14 = arith.constant dense<0.000000e+00> : vector<32x128xf32>
    %18 = tpu.matmul %16, %17, %cst_14 {dimension_numbers = #tpu.dot_dimension_numbers<[1], [0], [0], [1], [0, 0, 1, 1], [], []>} : vector<32x128xbf16>, vector<128x128xbf16>, vector<32x128xf32> -> vector<32x128xf32>
    %c0_15 = arith.constant 0 : index
    %c0_16 = arith.constant 0 : index
    %19 = vector.load %arg7[%c0_15, %c0_16] : memref<32x1xf32, #tpu.memory_space<vmem>>, vector<32x1xf32>
    %20 = vector.broadcast %19 : vector<32x1xf32> to vector<32x128xf32>
    %21 = arith.addf %18, %20 : vector<32x128xf32>
    %cst_17 = arith.constant 0.000000e+00 : f32
    %22 = vector.broadcast %cst_17 : f32 to vector<32x128xf32>
    %23 = arith.maximumf %21, %22 : vector<32x128xf32>
    %c0_18 = arith.constant 0 : index
    %c0_19 = arith.constant 0 : index
    %24 = vector.load %arg8[%c0_18, %c0_19] : memref<1x32xbf16, #tpu.memory_space<vmem>>, vector<1x32xbf16>
    %25 = arith.truncf %23 : vector<32x128xf32> to vector<32x128xbf16>
    %cst_20 = arith.constant dense<0.000000e+00> : vector<1x128xf32>
    %26 = tpu.matmul %24, %25, %cst_20 {dimension_numbers = #tpu.dot_dimension_numbers<[1], [0], [0], [1], [0, 0, 1, 1], [], []>} : vector<1x32xbf16>, vector<32x128xbf16>, vector<1x128xf32> -> vector<1x128xf32>
    %c0_21 = arith.constant 0 : index
    %c0_22 = arith.constant 0 : index
    %27 = vector.load %arg9[%c0_21, %c0_22] : memref<1x1xf32, #tpu.memory_space<vmem>>, vector<1x1xf32>
    %28 = vector.broadcast %27 : vector<1x1xf32> to vector<1x128xf32>
    %29 = arith.addf %26, %28 : vector<1x128xf32>
    %c0_23 = arith.constant 0 : index
    %c0_24 = arith.constant 0 : index
    %30 = vector.load %arg10[%c0_23, %c0_24] : memref<1x128xf32, #tpu.memory_space<vmem>>, vector<1x128xf32>
    tpu.vector_store %arg10[%c0_23, %c0_24], %29 {strides = array<i32>} : memref<1x128xf32, #tpu.memory_space<vmem>>, vector<1x128xf32>,
    return
  }
  func.func @transform_0(%arg0: i32) -> (i32, i32) {
    %c0_i32 = arith.constant 0 : i32
    %c0_i32_0 = arith.constant 0 : i32
    return %c0_i32, %arg0 : i32, i32
  }
  func.func @transform_1(%arg0: i32) -> (i32, i32) {
    %c0_i32 = arith.constant 0 : i32
    %c0_i32_0 = arith.constant 0 : i32
    %c0_i32_1 = arith.constant 0 : i32
    return %c0_i32, %c0_i32_0 : i32, i32
  }
  func.func @transform_2(%arg0: i32) -> (i32, i32) {
    %c0_i32 = arith.constant 0 : i32
    %c0_i32_0 = arith.constant 0 : i32
    %c0_i32_1 = arith.constant 0 : i32
    return %c0_i32, %c0_i32_0 : i32, i32
  }
  func.func @transform_3(%arg0: i32) -> (i32, i32) {
    %c0_i32 = arith.constant 0 : i32
    %c0_i32_0 = arith.constant 0 : i32
    %c0_i32_1 = arith.constant 0 : i32
    return %c0_i32, %c0_i32_0 : i32, i32
  }
  func.func @transform_4(%arg0: i32) -> (i32, i32) {
    %c0_i32 = arith.constant 0 : i32
    %c0_i32_0 = arith.constant 0 : i32
    %c0_i32_1 = arith.constant 0 : i32
    return %c0_i32, %c0_i32_0 : i32, i32
  }
  func.func @transform_5(%arg0: i32) -> (i32, i32) {
    %c0_i32 = arith.constant 0 : i32
    %c0_i32_0 = arith.constant 0 : i32
    %c0_i32_1 = arith.constant 0 : i32
    return %c0_i32, %c0_i32_0 : i32, i32
  }
  func.func @transform_6(%arg0: i32) -> (i32, i32) {
    %c0_i32 = arith.constant 0 : i32
    %c0_i32_0 = arith.constant 0 : i32
    %c0_i32_1 = arith.constant 0 : i32
    return %c0_i32, %c0_i32_0 : i32, i32
  }
  func.func @transform_7(%arg0: i32) -> (i32, i32) {
    %c0_i32 = arith.constant 0 : i32
    %c0_i32_0 = arith.constant 0 : i32
    %c0_i32_1 = arith.constant 0 : i32
    return %c0_i32, %c0_i32_0 : i32, i32
  }
  func.func @transform_8(%arg0: i32) -> (i32, i32) {
    %c0_i32 = arith.constant 0 : i32
    %c0_i32_0 = arith.constant 0 : i32
    %c0_i32_1 = arith.constant 0 : i32
    return %c0_i32, %c0_i32_0 : i32, i32
  }
  func.func @transform_9(%arg0: i32) -> (i32, i32) {
    %c0_i32 = arith.constant 0 : i32
    %c0_i32_0 = arith.constant 0 : i32
    return %c0_i32, %arg0 : i32, i32
  }
}

</mosaic_0001>

<bundles_post_ra>
// kernel: tpu_custom_call.1
= control target key start
LH: loop header
LB: loop body
LE: loop exit
PB: predicated region body
PF: predicated region fallthrough
CT: control target
= control target key end

     0   :  { %s1230_s0 = inlined_call_operand.vmem [shape: bf16[14,128], index: 0, kind: input, shape index: {}]   ;;  %s1231_s1 = inlined_call_operand.vmem [shape: bf16[128,14], index: 1, kind: input, shape index: {}]   ;;  %s1232_s2 = inlined_call_operand.vmem [shape: f32[128,1], index: 2, kind: input, shape index: {}]   ;;  %s1233_s3 = inlined_call_operand.vmem [shape: bf16[128,128], index: 3, kind: input, shape index: {}]   ;;  %s1234_s4 = inlined_call_operand.vmem [shape: f32[128,1], index: 4, kind: input, shape index: {}]   ;;  %s1235_s5 = inlined_call_operand.vmem [shape: bf16[32,128], index: 5, kind: input, shape index: {}]   ;;  %s1236_s6 = inlined_call_operand.vmem [shape: f32[32,1], index: 6, kind: input, shape index: {}]   ;;  %s1237_s7 = inlined_call_operand.vmem [shape: bf16[1,32], index: 7, kind: input, shape index: {}]   ;;  %s1238_s8 = inlined_call_operand.<no memory space> [shape: f32[1,1], index: 8, kind: input, shape index: {}]   ;;  %s1239_s9 = inlined_call_operand.hbm [shape: f32[1,128], index: 9, kind: output, shape index: {}]  }
   0x1   :  { %v14_v0 = vstv %s1238_s8 }
   0x2   :  { %15 = vst [vmem:[#allocation2] sm:$0x1] %v14_v0 }
   0x3   :  { %v942_v1 = vld [vmem:[%s1230_s0] sm:$0x7f]   ;;  %vm220_vm0 = vcmask 1046528   ;;  %vm195_vm1 = vcmask 113664   ;;  %v944_v4 = vld [vmem:[%s1231_s1 + $0x8] sm:$0xff]   ;;  %v945_v5 = vld [vmem:[%s1231_s1 + $0x10] sm:$0xff]  }
   0x4   :  { %v943_v2 = vld [vmem:[%s1231_s1] sm:$0xff]   ;;  %935 = vmatprep.subr.msk.bf16.mxu0 %vm220_vm0, %v942_v1  ;;  %v222_v3 = vsel %vm220_vm0, %v942_v1, 0  ;;  %v985_v6 = vmov 0   ;;  %v55_v8 = vld [vmem:[%s1232_s2 + $0x8] sm:$0xff]  ;;  %v56_v9 = vld [vmem:[%s1232_s2 + $0x10] sm:$0xff] }
   0x5   :  { %858 = vmatpush3.bf16.msra.mxu0 %v222_v3  ;;  %859 = vmatprep.mubr.msk.bf16.mxu0 %vm195_vm1, %v943_v2  ;;  %v54_v7 = vld [vmem:[%s1232_s2] sm:$0xff]  ;;  %v946_v10 = vld [vmem:[%s1231_s1 + $0x18] sm:$0xff]   ;;  %v59_v14 = vld [vmem:[%s1232_s2 + $0x28] sm:$0xff] }
   0x6   :  { %940 = vset.pattern.permute.xlu0 %v985_v6  ;;  %941 = vset.pattern.permute.xlu1 %v985_v6  ;;  %v57_v11 = vld [vmem:[%s1232_s2 + $0x18] sm:$0xff]  ;;  %v947_v12 = vld [vmem:[%s1231_s1 + $0x20] sm:$0xff]   ;;  %v60_v15 = vld [vmem:[%s1232_s2 + $0x30] sm:$0xff] }
   0x7   :  { %72 = vperm.xlu0 %940, %v54_v7   ;;  %82 = vperm.xlu1 %941, %v56_v9   ;;  %v58_v13 = vld [vmem:[%s1232_s2 + $0x20] sm:$0xff]  ;;  %v948_v16 = vld [vmem:[%s1231_s1 + $0x28] sm:$0xff]   ;;  %v61_v17 = vld [vmem:[%s1232_s2 + $0x38] sm:$0xff] }
   0x8   :  { %860 = vmatmul.mubr.msk.bf16.vlgmr.msra.gmra.mrb[0].mxu0 %vm195_vm1, %v944_v4  ;;  %v949_v18 = vld [vmem:[%s1231_s1 + $0x30] sm:$0xff]   ;;  %v62_v19 = vld [vmem:[%s1232_s2 + $0x40] sm:$0xff]  ;;  %v63_v21 = vld [vmem:[%s1232_s2 + $0x48] sm:$0xff] }
   0x9   :  { %863 = vmatprep.mubr.msk.bf16.mxu0 %vm195_vm1, %v945_v5  ;;  %v64_v20 = vld [vmem:[%s1232_s2 + $0x50] sm:$0xff]  ;;  %v950_v22 = vld [vmem:[%s1231_s1 + $0x38] sm:$0xff]   ;;  %v66_v24 = vld [vmem:[%s1232_s2 + $0x60] sm:$0xff] }
   0xa   :  { %v65_v23 = vld [vmem:[%s1232_s2 + $0x58] sm:$0xff] }
   0xb   :  { %77 = vperm.xlu0 %940, %v55_v8   ;;  %87 = vperm.xlu1 %941, %v57_v11  }
   0xf   :  { %92 = vperm.xlu0 %940, %v58_v13   ;;  %97 = vperm.xlu1 %941, %v59_v14  }
  0x10   :  { %864 = vmatmul.mubr.msk.bf16.gmra.mrb[4].mxu0 %vm195_vm1, %v946_v10 }
  0x11   :  { %867 = vmatprep.mubr.msk.bf16.mxu0 %vm195_vm1, %v947_v12 }
  0x13   :  { %102 = vperm.xlu0 %940, %v60_v15   ;;  %107 = vperm.xlu1 %941, %v61_v17  }
  0x17   :  { %112 = vperm.xlu0 %940, %v62_v19   ;;  %117 = vperm.xlu1 %941, %v63_v21  }
  0x18   :  { %868 = vmatmul.mubr.msk.bf16.gmra.mrb[8].mxu0 %vm195_vm1, %v948_v16 }
  0x19   :  { %871 = vmatprep.mubr.msk.bf16.mxu0 %vm195_vm1, %v949_v18 }
  0x1b   :  { %122 = vperm.xlu0 %940, %v64_v20  }
  0x1c   :  { %16 = vsyncpa [#allocation4], 0  ;;  %127 = vperm.xlu1 %941, %v65_v23   ;;  %v67_v25 = vld [vmem:[%s1232_s2 + $0x68] sm:$0xff]  ;;  %v68_v26 = vld [vmem:[%s1232_s2 + $0x70] sm:$0xff]  ;;  %vm987_vm2 = vmmov 0   ;;  %vm732_vm3 = vcmask 261120  }
  0x1d   :  { %v69_v27 = vld [vmem:[%s1232_s2 + $0x78] sm:$0xff]  ;;  %v361_v28 = vld [vmem:[%s1234_s4] sm:$0xff]  ;;  %v362_v29 = vld [vmem:[%s1234_s4 + $0x8] sm:$0xff]  ;;  %s988_s2 = smov [#allocation3]  }
  0x1e   :  { %v363_v30 = vld [vmem:[%s1234_s4 + $0x10] sm:$0xff]  ;;  %v364_v31 = vld [vmem:[%s1234_s4 + $0x18] sm:$0xff]  ;;  %v365_v32 = vld [vmem:[%s1234_s4 + $0x20] sm:$0xff]  ;;  %s783_s20 = sshll.u32 %s988_s2, 4  ;;  %s784_s20 = int_to_ptr.vmem [resolvable:$true] %s783_s20 }
  0x1f   :  { %132 = vperm.xlu0 %940, %v66_v24   ;;  %v366_v33 = vld [vmem:[%s1234_s4 + $0x28] sm:$0xff]  ;;  %v367_v34 = vld [vmem:[%s1234_s4 + $0x30] sm:$0xff]  ;;  %v368_v35 = vld [vmem:[%s1234_s4 + $0x38] sm:$0xff]  ;;  %s961_s21 = scalar_lea.vmem %s784_s20, 16  ;;  %s965_s22 = scalar_lea.vmem %s784_s20, 32 }
  0x20   :  { %872 = vmatmul.mubr.msk.bf16.gmra.mrb[12].mxu0 %vm195_vm1, %v950_v22  ;;  %137 = vperm.xlu1 %941, %v67_v25   ;;  %v369_v36 = vld [vmem:[%s1234_s4 + $0x40] sm:$0xff]  ;;  %v370_v37 = vld [vmem:[%s1234_s4 + $0x48] sm:$0xff]  ;;  %v371_v38 = vld [vmem:[%s1234_s4 + $0x50] sm:$0xff]  ;;  %p962_p0 = scmp.ne.s32.totalorder %s784_s20, %s961_s21  ;;  %p966_p1 = scmp.lt.s32.totalorder %s784_s20, %s784_s20 }
  0x21   :  { %v372_v39 = vld [vmem:[%s1234_s4 + $0x58] sm:$0xff]  ;;  %v373_v40 = vld [vmem:[%s1234_s4 + $0x60] sm:$0xff]  ;;  %v374_v41 = vld [vmem:[%s1234_s4 + $0x68] sm:$0xff]  ;;  %p967_p2 = scmp.lt.s32.totalorder %s965_s22, %s961_s21 }
  0x22   :  { %v375_v42 = vld [vmem:[%s1234_s4 + $0x70] sm:$0xff]  ;;  %v376_v43 = vld [vmem:[%s1234_s4 + $0x78] sm:$0xff]  ;;  %v630_v44 = vld [vmem:[%s1236_s6] sm:$0xff] }
  0x23   :  { %142 = vperm.xlu0 %940, %v68_v26   ;;  %v631_v45 = vld [vmem:[%s1236_s6 + $0x8] sm:$0xff]  ;;  %v632_v46 = vld [vmem:[%s1236_s6 + $0x10] sm:$0xff]  ;;  %v633_v47 = vld [vmem:[%s1236_s6 + $0x18] sm:$0xff]  ;;  %p968_p3 = por %p967_p2, %p966_p1 }
  0x24   :  { %147 = vperm.xlu1 %941, %v69_v27   ;;  %v722_v48 = vld [vmem:[#allocation2] sm:$0x1] }
  0x25   :  { %v951_v49 = vld [vmem:[%s1233_s3] sm:$0xff]   ;;  %p969_p4 = pnand %p968_p3, %p962_p0 }
  0x26   :  { %891 = vmatprep.mubr.bf16.mxu1 %v951_v49 }
  0x27   :  { %379 = vperm.xlu0 %940, %v361_v28  }
  0x28   :  { %384 = vperm.xlu1 %941, %v362_v29  }
  0x2b   :  { %389 = vperm.xlu0 %940, %v363_v30  }
  0x2c   :  { %394 = vperm.xlu1 %941, %v364_v31  }
  0x2f   :  { %399 = vperm.xlu0 %940, %v365_v32  }
  0x30   :  { %404 = vperm.xlu1 %941, %v366_v33  }
  0x33   :  { %409 = vperm.xlu0 %940, %v367_v34  }
  0x34   :  { %414 = vperm.xlu1 %941, %v368_v35  }
  0x37   :  { %419 = vperm.xlu0 %940, %v369_v36  }
  0x38   :  { %424 = vperm.xlu1 %941, %v370_v37  }
  0x3b   :  { %429 = vperm.xlu0 %940, %v371_v38  }
  0x3c   :  { %434 = vperm.xlu1 %941, %v372_v39  }
  0x3f   :  { %439 = vperm.xlu0 %940, %v373_v40  }
  0x40   :  { %444 = vperm.xlu1 %941, %v374_v41  }
  0x43   :  { %449 = vperm.xlu0 %940, %v375_v42  }
  0x44   :  { %454 = vperm.xlu1 %941, %v376_v43  }
  0x47   :  { %636 = vperm.xlu0 %940, %v630_v44  }
  0x48   :  { %641 = vperm.xlu1 %941, %v631_v45  }
  0x4b   :  { %646 = vperm.xlu0 %940, %v632_v46  }
  0x4c   :  { %651 = vperm.xlu1 %941, %v633_v47  }
  0x4f   :  { %725 = vperm.xlu0 %940, %v722_v48  }
  0x86   :  { %v73_v50 = vpop.permute.xlu0 %72  ;;  %v83_v51 = vpop.permute.xlu1 %82 }
  0x8a   :  { %v78_v52 = vpop.permute.xlu0 %77  ;;  %v88_v53 = vpop.permute.xlu1 %87 }
  0x8e   :  { %v93_v54 = vpop.permute.xlu0 %92  ;;  %v98_v55 = vpop.permute.xlu1 %97 }
  0x92   :  { %v103_v56 = vpop.permute.xlu0 %102  ;;  %v108_v60 = vpop.permute.xlu1 %107 }
  0x96   :  { %v113_v4 = vpop.permute.xlu0 %112  ;;  %v118_v8 = vpop.permute.xlu1 %117 }
  0x9a   :  { %v123_v17 = vpop.permute.xlu0 %122 }
  0x9b   :  { %v128_v21 = vpop.permute.xlu1 %127 }
  0x9e   :  { %v133_v29 = vpop.permute.xlu0 %132 }
  0x9f   :  { %v138_v34 = vpop.permute.xlu1 %137 }
  0xa2   :  { %v143_v41 = vpop.permute.xlu0 %142 }
  0xa3   :  { %v148_v46 = vpop.permute.xlu1 %147 }
  0xdb   :  { %v861_v57 = vpop.f32.mrb[0].mxu0 }
  0xdc   :  { %v267_v58 = vadd.f32 %v861_v57, %v83_v51  ;;  %v258_v59 = vpop.f32.mrb[1].mxu0 }
  0xdd   :  { %v259_v61 = vadd.f32 %v258_v59, %v73_v50  ;;  %v862_v62 = vpop.f32.mrb[2].mxu0  ;;  %v953_v59 = vld [vmem:[%s1233_s3 + $0x10] sm:$0xff]  }
  0xde   :  { %v270_v63 = vadd.f32 %v862_v62, %v88_v53  ;;  %v261_v0 = vpop.f32.mrb[3].mxu0  ;;  %v323_v2 = vmax.f32 %v267_v58, 0.0  ;;  %v952_v58 = vld [vmem:[%s1233_s3 + $0x8] sm:$0xff]  }
  0xdf   :  { %v262_v1 = vadd.f32 %v261_v0, %v78_v52  ;;  %v321_v5 = vmax.f32 %v259_v61, 0.0  ;;  %v955_v61 = vld [vmem:[%s1233_s3 + $0x20] sm:$0xff]   ;;  %v956_v62 = vld [vmem:[%s1233_s3 + $0x28] sm:$0xff]   ;;  %v958_v0 = vld [vmem:[%s1233_s3 + $0x38] sm:$0xff]  }
  0xe0   :  { %v324_v3 = vmax.f32 %v270_v63, 0.0  ;;  %v957_v63 = vld [vmem:[%s1233_s3 + $0x30] sm:$0xff]  }
  0xe1   :  { %v322_v6 = vmax.f32 %v262_v1, 0.0  ;;  %v959_v1 = vld [vmem:[%s1235_s5] sm:$0xff]  }
  0xe2   :  { %v354_v7 = vpack.c.bf16 %v324_v3, %v323_v2  ;;  %923 = vmatprep.mubr.bf16.mxu0 %v959_v1  ;;  %v380_v2 = vpop.permute.xlu0 %379  ;;  %v385_v3 = vpop.permute.xlu1 %384 }
  0xe3   :  { %v865_v9 = vpop.f32.mrb[4].mxu0  ;;  %v353_v10 = vpack.c.bf16 %v322_v6, %v321_v5 }
  0xe4   :  { %v283_v11 = vadd.f32 %v865_v9, %v103_v56  ;;  %v274_v12 = vpop.f32.mrb[5].mxu0 }
  0xe5   :  { %v275_v13 = vadd.f32 %v274_v12, %v93_v54  ;;  %v866_v14 = vpop.f32.mrb[6].mxu0  ;;  %875 = vmatprep.subr.bf16.mxu1 %v353_v10 }
  0xe6   :  { %v286_v15 = vadd.f32 %v866_v14, %v108_v60  ;;  %v277_v16 = vpop.f32.mrb[7].mxu0  ;;  %876 = vmatpush3.bf16.msra.mxu1 %v353_v10  ;;  %v327_v19 = vmax.f32 %v283_v11, 0.0  ;;  %v954_v60 = vld [vmem:[%s1233_s3 + $0x18] sm:$0xff]   ;;  %v395_v5 = vpop.permute.xlu1 %394 }
  0xe7   :  { %v278_v18 = vadd.f32 %v277_v16, %v98_v55  ;;  %877 = vmatprep.subr.bf16.mxu1 %v354_v7  ;;  %v325_v22 = vmax.f32 %v275_v13, 0.0 }
  0xe8   :  { %v328_v20 = vmax.f32 %v286_v15, 0.0 }
  0xe9   :  { %v326_v23 = vmax.f32 %v278_v18, 0.0 }
  0xea   :  { %v356_v24 = vpack.c.bf16 %v328_v20, %v327_v19  ;;  %878 = vmatpush3.bf16.msra.mxu1 %v354_v7  ;;  %v405_v7 = vpop.permute.xlu1 %404 }
  0xeb   :  { %v355_v25 = vpack.c.bf16 %v326_v23, %v325_v22  ;;  %v869_v26 = vpop.f32.mrb[8].mxu0 }
  0xec   :  { %v299_v27 = vadd.f32 %v869_v26, %v123_v17  ;;  %v290_v28 = vpop.f32.mrb[9].mxu0 }
  0xed   :  { %v291_v30 = vadd.f32 %v290_v28, %v113_v4  ;;  %v870_v31 = vpop.f32.mrb[10].mxu0  ;;  %879 = vmatprep.subr.bf16.mxu1 %v355_v25  ;;  %v390_v4 = vpop.permute.xlu0 %389 }
  0xee   :  { %v302_v32 = vadd.f32 %v870_v31, %v128_v21  ;;  %v293_v33 = vpop.f32.mrb[11].mxu0  ;;  %880 = vmatpush3.bf16.msra.mxu1 %v355_v25  ;;  %v331_v36 = vmax.f32 %v299_v27, 0.0  ;;  %v415_v12 = vpop.permute.xlu1 %414 }
  0xef   :  { %v294_v35 = vadd.f32 %v293_v33, %v118_v8  ;;  %881 = vmatprep.subr.bf16.mxu1 %v356_v24  ;;  %v329_v38 = vmax.f32 %v291_v30, 0.0 }
  0xf0   :  { %v332_v37 = vmax.f32 %v302_v32, 0.0 }
  0xf1   :  { %v330_v39 = vmax.f32 %v294_v35, 0.0  ;;  %v400_v6 = vpop.permute.xlu0 %399 }
  0xf2   :  { %v358_v40 = vpack.c.bf16 %v332_v37, %v331_v36  ;;  %882 = vmatpush3.bf16.msra.mxu1 %v356_v24  ;;  %v425_v24 = vpop.permute.xlu1 %424 }
  0xf3   :  { %v357_v42 = vpack.c.bf16 %v330_v39, %v329_v38  ;;  %v873_v43 = vpop.f32.mrb[12].mxu0 }
  0xf4   :  { %v315_v44 = vadd.f32 %v873_v43, %v143_v41  ;;  %v306_v45 = vpop.f32.mrb[13].mxu0 }
  0xf5   :  { %v307_v47 = vadd.f32 %v306_v45, %v133_v29  ;;  %v874_v48 = vpop.f32.mrb[14].mxu0  ;;  %883 = vmatprep.subr.bf16.mxu1 %v357_v42  ;;  %v410_v8 = vpop.permute.xlu0 %409 }
  0xf6   :  { %v318_v49 = vadd.f32 %v874_v48, %v148_v46  ;;  %v309_v50 = vpop.f32.mrb[15].mxu0  ;;  %884 = vmatpush3.bf16.msra.mxu1 %v357_v42  ;;  %v335_v52 = vmax.f32 %v315_v44, 0.0  ;;  %v435_v37 = vpop.permute.xlu1 %434 }
  0xf7   :  { %v310_v51 = vadd.f32 %v309_v50, %v138_v34  ;;  %885 = vmatprep.subr.bf16.mxu1 %v358_v40  ;;  %v333_v54 = vmax.f32 %v307_v47, 0.0 }
  0xf8   :  { %v336_v53 = vmax.f32 %v318_v49, 0.0 }
  0xf9   :  { %v334_v55 = vmax.f32 %v310_v51, 0.0  ;;  %v420_v20 = vpop.permute.xlu0 %419 }
  0xfa   :  { %v360_v56 = vpack.c.bf16 %v336_v53, %v335_v52  ;;  %886 = vmatpush3.bf16.msra.mxu1 %v358_v40  ;;  %v445_v50 = vpop.permute.xlu1 %444 }
  0xfb   :  { %v359_v57 = vpack.c.bf16 %v334_v55, %v333_v54 }
  0xfd   :  { %887 = vmatprep.subr.bf16.mxu1 %v359_v57  ;;  %v430_v33 = vpop.permute.xlu0 %429 }
  0xfe   :  { %888 = vmatpush3.bf16.msra.mxu1 %v359_v57 }
  0xff   :  { %889 = vmatprep.subr.bf16.mxu1 %v360_v56 }
 0x101   :  { %v440_v45 = vpop.permute.xlu0 %439 }
 0x102   :  { %890 = vmatpush3.bf16.msra.mxu1 %v360_v56 }
 0x105   :  { %892 = vmatmul.mubr.bf16.vlgmr.msra.gmra.mrb[0].mxu1 %v952_v58  ;;  %v450_v57 = vpop.permute.xlu0 %449 }
 0x106   :  { %895 = vmatprep.mubr.bf16.mxu1 %v953_v59 }
 0x10d   :  { %896 = vmatmul.mubr.bf16.gmra.mrb[4].mxu1 %v954_v60 }
 0x10e   :  { %899 = vmatprep.mubr.bf16.mxu1 %v955_v61 }
 0x115   :  { %900 = vmatmul.mubr.bf16.gmra.mrb[8].mxu1 %v956_v62  ;;  %v455_v62 = vpop.permute.xlu1 %454 }
 0x116   :  { %903 = vmatprep.mubr.bf16.mxu1 %v957_v63 }
 0x11d   :  { %904 = vmatmul.mubr.bf16.gmra.mrb[12].mxu1 %v958_v0 }
 0x1d8   :  { %v893_v9 = vpop.f32.mrb[0].mxu1 }
 0x1d9   :  { %v548_v10 = vadd.f32 %v893_v9, %v390_v4  ;;  %v539_v11 = vpop.f32.mrb[1].mxu1 }
 0x1da   :  { %v540_v13 = vadd.f32 %v539_v11, %v380_v2  ;;  %v894_v14 = vpop.f32.mrb[2].mxu1  ;;  %v986_v11 = vmov 0.0  }
 0x1db   :  { %v551_v15 = vadd.f32 %v894_v14, %v395_v5  ;;  %v542_v16 = vpop.f32.mrb[3].mxu1  ;;  %v604_v18 = vmax.f32 %v548_v10, 0.0  ;;  %v960_v10 = vld [vmem:[%s1235_s5 + $0x8] sm:$0xff]  }
 0x1dc   :  { %v543_v17 = vadd.f32 %v542_v16, %v385_v3  ;;  %v602_v21 = vmax.f32 %v540_v13, 0.0  ;;  %v642_v13 = vpop.permute.xlu1 %641 }
 0x1dd   :  { %v605_v19 = vmax.f32 %v551_v15, 0.0 }
 0x1de   :  { %v603_v22 = vmax.f32 %v543_v17, 0.0 }
 0x1df   :  { %v623_v23 = vpack.c.bf16 %v605_v19, %v604_v18 }
 0x1e0   :  { %v622_v25 = vpack.c.bf16 %v603_v22, %v602_v21  ;;  %v897_v26 = vpop.f32.mrb[4].mxu1  ;;  %v652_v18 = vpop.permute.xlu1 %651 }
 0x1e1   :  { %v564_v27 = vadd.f32 %v897_v26, %v410_v8  ;;  %v555_v28 = vpop.f32.mrb[5].mxu1 }
 0x1e2   :  { %v556_v29 = vadd.f32 %v555_v28, %v400_v6  ;;  %v898_v30 = vpop.f32.mrb[6].mxu1  ;;  %907 = vmatprep.subr.bf16.mxu0 %v622_v25 }
 0x1e3   :  { %v567_v31 = vadd.f32 %v898_v30, %v415_v12  ;;  %v558_v32 = vpop.f32.mrb[7].mxu1  ;;  %908 = vmatpush3.bf16.msra.mxu0 %v622_v25  ;;  %v608_v35 = vmax.f32 %v564_v27, 0.0  ;;  %v637_v12 = vpop.permute.xlu0 %636  ;;  %v719_v30 = vld [vmem:[%s1237_s7] sm:$0x1] }
 0x1e4   :  { %v559_v34 = vadd.f32 %v558_v32, %v405_v7  ;;  %909 = vmatprep.subr.bf16.mxu0 %v623_v23  ;;  %v606_v38 = vmax.f32 %v556_v29, 0.0 }
 0x1e5   :  { %v609_v36 = vmax.f32 %v567_v31, 0.0  ;;  %v728_v31 = vlaneseq }
 0x1e6   :  { %v607_v39 = vmax.f32 %v559_v34, 0.0 }
 0x1e7   :  { %v625_v40 = vpack.c.bf16 %v609_v36, %v608_v35  ;;  %910 = vmatpush3.bf16.msra.mxu0 %v623_v23  ;;  %v647_v14 = vpop.permute.xlu0 %646  ;;  %v729_v32 = vshrl.u32 %v728_v31, 7 }
 0x1e8   :  { %v624_v41 = vpack.c.bf16 %v607_v39, %v606_v38  ;;  %v901_v42 = vpop.f32.mrb[8].mxu1 }
 0x1e9   :  { %v580_v43 = vadd.f32 %v901_v42, %v430_v33  ;;  %v571_v44 = vpop.f32.mrb[9].mxu1  ;;  %v730_v33 = vsub.s32 0, %v729_v32 }
 0x1ea   :  { %v572_v46 = vadd.f32 %v571_v44, %v420_v20  ;;  %v902_v47 = vpop.f32.mrb[10].mxu1  ;;  %911 = vmatprep.subr.bf16.mxu0 %v624_v41 }
 0x1eb   :  { %v583_v48 = vadd.f32 %v902_v47, %v435_v37  ;;  %v574_v49 = vpop.f32.mrb[11].mxu1  ;;  %912 = vmatpush3.bf16.msra.mxu0 %v624_v41  ;;  %v612_v52 = vmax.f32 %v580_v43, 0.0  ;;  %v726_v34 = vpop.permute.xlu0 %725 }
 0x1ec   :  { %v575_v51 = vadd.f32 %v574_v49, %v425_v24  ;;  %913 = vmatprep.subr.bf16.mxu0 %v625_v40  ;;  %v610_v54 = vmax.f32 %v572_v46, 0.0  ;;  %v731_v35 = vrot.slane %v726_v34, %v730_v33 }
 0x1ed   :  { %v613_v53 = vmax.f32 %v583_v48, 0.0 }
 0x1ee   :  { %v611_v55 = vmax.f32 %v575_v51, 0.0 }
 0x1ef   :  { %v627_v56 = vpack.c.bf16 %v613_v53, %v612_v52  ;;  %914 = vmatpush3.bf16.msra.mxu0 %v625_v40 }
 0x1f0   :  { %v626_v58 = vpack.c.bf16 %v611_v55, %v610_v54  ;;  %v905_v59 = vpop.f32.mrb[12].mxu1 }
 0x1f1   :  { %v596_v60 = vadd.f32 %v905_v59, %v450_v57  ;;  %v587_v61 = vpop.f32.mrb[13].mxu1 }
 0x1f2   :  { %v588_v63 = vadd.f32 %v587_v61, %v440_v45  ;;  %v906_v0 = vpop.f32.mrb[14].mxu1  ;;  %915 = vmatprep.subr.bf16.mxu0 %v626_v58 }
 0x1f3   :  { %v599_v1 = vadd.f32 %v906_v0, %v455_v62  ;;  %v590_v2 = vpop.f32.mrb[15].mxu1  ;;  %916 = vmatpush3.bf16.msra.mxu0 %v626_v58  ;;  %v616_v4 = vmax.f32 %v596_v60, 0.0 }
 0x1f4   :  { %v591_v3 = vadd.f32 %v590_v2, %v445_v50  ;;  %917 = vmatprep.subr.bf16.mxu0 %v627_v56  ;;  %v614_v6 = vmax.f32 %v588_v63, 0.0 }
 0x1f5   :  { %v617_v5 = vmax.f32 %v599_v1, 0.0 }
 0x1f6   :  { %v615_v7 = vmax.f32 %v591_v3, 0.0 }
 0x1f7   :  { %v629_v8 = vpack.c.bf16 %v617_v5, %v616_v4  ;;  %918 = vmatpush3.bf16.msra.mxu0 %v627_v56 }
 0x1f8   :  { %v628_v9 = vpack.c.bf16 %v615_v7, %v614_v6 }
 0x1fa   :  { %919 = vmatprep.subr.bf16.mxu0 %v628_v9 }
 0x1fb   :  { %920 = vmatpush3.bf16.msra.mxu0 %v628_v9 }
 0x1fc   :  { %921 = vmatprep.subr.bf16.mxu0 %v629_v8 }
 0x1ff   :  { %922 = vmatpush3.bf16.msra.mxu0 %v629_v8 }
 0x200   :  { %927 = vmatprep.subr.bf16.mxu0 %v986_v11 }
 0x202   :  { %924 = vmatmul.mubr.bf16.vlgmr.msra.gmra.mrb[16].mxu0 %v960_v10 }
 0x203   :  { %931 = vmatprep.mubr.msk.bf16.mxu0 %vm987_vm2, %v986_v11 }
 0x2d5   :  { %v925_v15 = vpop.f32.mrb[16].mxu0 }
 0x2d6   :  { %v709_v16 = vadd.f32 %v925_v15, %v647_v14  ;;  %v700_v17 = vpop.f32.mrb[17].mxu0 }
 0x2d7   :  { %v701_v19 = vadd.f32 %v700_v17, %v637_v12  ;;  %v926_v20 = vpop.f32.mrb[18].mxu0 }
 0x2d8   :  { %v712_v21 = vadd.f32 %v926_v20, %v652_v18  ;;  %v703_v22 = vpop.f32.mrb[19].mxu0  ;;  %v717_v24 = vmax.f32 %v709_v16, 0.0 }
 0x2d9   :  { %v704_v23 = vadd.f32 %v703_v22, %v642_v13  ;;  %v715_v26 = vmax.f32 %v701_v19, 0.0 }
 0x2da   :  { %v718_v25 = vmax.f32 %v712_v21, 0.0 }
 0x2db   :  { %v716_v27 = vmax.f32 %v704_v23, 0.0 }
 0x2dc   :  { %v721_v28 = vpack.c.bf16 %v718_v25, %v717_v24 }
 0x2dd   :  { %v720_v29 = vpack.c.bf16 %v716_v27, %v715_v26 }
 0x2df   :  { %928 = vmatpush3.bf16.msra.mxu0 %v720_v29 }
 0x2e0   :  { %929 = vmatprep.subr.bf16.mxu0 %v986_v11 }
 0x2e3   :  { %930 = vmatpush3.bf16.msra.mxu0 %v721_v28 }
 0x2e6   :  { %932 = vmatmul.mubr.msk.bf16.vlgmr.msra.gmra.mrb[20].mxu0 %vm732_vm3, %v719_v30 }
 0x3b9   :  { %v770_v36 = vpop.f32.mrb[20].mxu0 }
 0x3ba   :  { %v771_v37 = vadd.f32 %v770_v36, %v731_v35  ;;  %v933_v38 = vpop.f32.mrb[21].mxu0 }
 0x3bb   :  { %v773_v39 = vpop.f32.mrb[22].mxu0 }
 0x3bc   :  { %776 = vst [vmem:[#allocation3] sm:$0x1] %v771_v37  ;;  %v934_v40 = vpop.f32.mrb[23].mxu0 }
 0x3bd   :  { %972 = shalt.err (!%p969_p4)
}
 0x3be   :  { %s973_s24 = scalar_lea.hbm %s1239_s9, 16 }
 0x3bf   :  { %p974_p5 = scmp.ne.s32.totalorder %s1239_s9, %s973_s24  ;;  %p977_p6 = scmp.lt.u32.totalorder %s973_s24, %s1239_s9 }
 0x3c1   :  { %p979_p7 = pnand %p977_p6, %p974_p5 }
 0x3c3   :  { %982 = shalt.err (!%p979_p7)
}
 0x3c4   :  { %786 = dma.vmem_to_hbm [thread:$0]  %s784_s20, 16, %s1239_s9, [#allocation4]  }
 0x3c5   :  { %983 = dma.done.wait [#allocation4], 16  }
 0x3c6   :  { %984 = vsyncadd [#allocation4], 4294967280 }
 0x3c7   :  { %790 = vsyncpa [#allocation4], 1 }

</bundles_post_ra>
